<compile_context>
chip_gen: v6e
topology: v6e:2x2x1
jax: 0.10.0
libtpu: 0.0.40
codegen_flags: <defaults>
</compile_context>

<pallas_src>
import functools

import jax
import jax.numpy as jnp
from jax.experimental import pallas as pl
from jax.experimental.pallas import tpu as pltpu


def _round_up(x, m):
    return ((x + m - 1) // m) * m


def _fused_mlp_kernel(n_layers, x_ref, *refs):
    # refs = (wt_0, b_0, wt_1, b_1, ..., wt_{L-1}, b_{L-1}, o_ref)
    *param_refs, o_ref = refs
    h = x_ref[...].astype(jnp.float32)              # (tb, K0p)
    for l in range(n_layers):
        wt = param_refs[2 * l][...]                 # (Kp, Np)  bf16, resident
        b = param_refs[2 * l + 1][...]              # (1, Np)   f32
        y = jnp.dot(h.astype(wt.dtype), wt,
                    preferred_element_type=jnp.float32)
        h = jnp.maximum(y + b, 0.0)                 # fused bias + ReLU, stays on-chip
    o_ref[...] = h.astype(o_ref.dtype)


def _choose_batch_tile(B, tile_b):
    tb = min(tile_b, _round_up(B, 8))
    # v7x has 2 TensorCores per chip: give the "parallel" batch axis >= 2 steps.
    if pl.cdiv(B, tb) < 2 and B > 8:
        tb = _round_up(pl.cdiv(B, 2), 8)
    return tb


def mlp_forward(x, padded_params, *, out_width, tile_b=512):
    """Fused relu(...relu(x @ W0 + b0)... @ WL + bL) as one pallas_call."""
    B, K = x.shape
    n_layers = len(padded_params)
    K0p = padded_params[0][0].shape[0]
    NLp = padded_params[-1][0].shape[1]

    tb = _choose_batch_tile(B, tile_b)
    Bp = pl.cdiv(B, tb) * tb

    xp = x
    if (Bp, K0p) != (B, K):
        xp = jnp.zeros((Bp, K0p), x.dtype).at[:B, :K].set(x)

    flat_params = []
    in_specs = [pl.BlockSpec((tb, K0p), lambda i: (i, 0))]
    for wt, b in padded_params:
        flat_params += [wt, b]
        in_specs.append(pl.BlockSpec(wt.shape, lambda i: (0, 0)))   # resident
        in_specs.append(pl.BlockSpec(b.shape, lambda i: (0, 0)))    # resident

    # Scheduler hint + explicit VMEM budget (fits v7x's 64 MiB with headroom).
    flops = sum(2 * Bp * wt.shape[0] * wt.shape[1] for wt, _ in padded_params)
    param_bytes = sum(wt.size * wt.dtype.itemsize + b.size * b.dtype.itemsize
                      for wt, b in padded_params)
    bytes_accessed = (xp.size * xp.dtype.itemsize
                      + Bp * NLp * xp.dtype.itemsize + param_bytes)
    max_wp = max(max(wt.shape) for wt, _ in padded_params)
    vmem_needed = (2 * tb * (K0p + NLp) * 4        # double-buffered in/out tiles
                   + param_bytes                   # resident weights + biases
                   + 2 * tb * max_wp * 4)          # f32 activation temporaries
    vmem_limit = int(min(max(2 * vmem_needed, 8 << 20), 48 << 20))

    grid = (Bp // tb,)
    out = pl.pallas_call(
        functools.partial(_fused_mlp_kernel, n_layers),
        out_shape=jax.ShapeDtypeStruct((Bp, NLp), x.dtype),
        grid_spec=pl.GridSpec(
            grid=grid,
            in_specs=in_specs,
            out_specs=pl.BlockSpec((tb, NLp), lambda i: (i, 0)),
        ),
        compiler_params=pltpu.CompilerParams(
            dimension_semantics=("parallel",),
            vmem_limit_bytes=vmem_limit,
        ),
        cost_estimate=pl.CostEstimate(
            flops=flops, transcendentals=0, bytes_accessed=bytes_accessed),
    )(xp, *flat_params)

    return out[:B, :out_width]


class MLPLayersPallas:
    """JAX/Pallas equivalent of the PyTorch MLPLayers module (bn=False)."""

    def __init__(self, layers, dropout=0.0, key=None, param_dtype=jnp.bfloat16):
        if key is None:
            key = jax.random.PRNGKey(0)
        self.layers = list(layers)
        self.dropout = dropout              # identity at inference time
        self.out_width = self.layers[-1]
        padded = [_round_up(n, 128) for n in self.layers]

        self.params = []          # exact f32 (wt, b) for the reference check
        self.padded_params = []   # lane-padded, weights in bf16
        for (in_s, out_s), (in_p, out_p) in zip(
                zip(self.layers[:-1], self.layers[1:]),
                zip(padded[:-1], padded[1:])):
            key, wkey = jax.random.split(key)
            # torch init: weight ~ N(0, 0.01), bias = 0; torch Linear weight is
            # (out, in) — we store the transpose (in, out) so y = x @ Wt + b.
            w = 0.01 * jax.random.normal(wkey, (out_s, in_s), dtype=jnp.float32)
            wt = jnp.transpose(w)                             # (in, out)
            b = jnp.zeros((1, out_s), dtype=jnp.float32)
            self.params.append((wt, b))

            wt_p = (jnp.zeros((in_p, out_p), jnp.float32)
                    .at[:in_s, :out_s].set(wt).astype(param_dtype))
            b_p = jnp.zeros((1, out_p), dtype=jnp.float32)
            self.padded_params.append((wt_p, b_p))

    def __call__(self, x, *, training=False, tile_b=512):
        if training and self.dropout > 0.0:
            # TODO(synk): stochastic training-mode dropout not implemented.
            raise NotImplementedError("training-mode dropout not implemented")
        return mlp_forward(x, self.padded_params,
                           out_width=self.out_width, tile_b=tile_b)


def _reference_forward(x, params, param_dtype=jnp.bfloat16):
    # Same bf16 weight/activation rounding + f32 accumulation as the kernel.
    h = x
    for wt, b in params:
        y = jnp.dot(h.astype(param_dtype), wt.astype(param_dtype),
                    preferred_element_type=jnp.float32)
        h = jnp.maximum(y + b, 0.0)
    return h


if __name__ == "__main__":
    key = jax.random.PRNGKey(0)
    key, xkey = jax.random.split(key)

    layers = [64, 32, 16]      # as in the module docstring example
    batch = 128

    model = MLPLayersPallas(layers, dropout=0.2, key=key)
    x = jax.random.normal(xkey, (batch, layers[0]), dtype=jnp.float32)

    out = jax.block_until_ready(model(x))

    ref = _reference_forward(x, model.params)
    assert out.shape == (batch, layers[-1]), out.shape
    assert jnp.allclose(out, ref, atol=1e-4, rtol=1e-3), (
        float(jnp.max(jnp.abs(out - ref))))

    print("KERNEL_OK")
</pallas_src>

<mosaic_0001>
module attributes {stable_mosaic.version = 11 : i64} {
  func.func @_fused_mlp_kernel(%arg0: i32, %arg1: memref<64x128xf32, #tpu.memory_space<vmem>>, %arg2: memref<128x128xbf16, #tpu.memory_space<vmem>>, %arg3: memref<1x128xf32, #tpu.memory_space<vmem>>, %arg4: memref<128x128xbf16, #tpu.memory_space<vmem>>, %arg5: memref<1x128xf32, #tpu.memory_space<vmem>>, %arg6: memref<64x128xf32, #tpu.memory_space<vmem>>) attributes {dimension_semantics = [#tpu.dimension_semantics<parallel>], iteration_bounds = array<i64: 2>, scalar_prefetch = 0 : i64, scratch_operands = 0 : i64, tpu.core_type = #tpu.core_type<tc>, window_params = [{transform_indices = @transform_0, window_bounds = array<i64: 64, 128>}, {pipeline_mode = #tpu.pipeline_mode<synchronous>, transform_indices = @transform_1, window_bounds = array<i64: 128, 128>}, {pipeline_mode = #tpu.pipeline_mode<synchronous>, transform_indices = @transform_2, window_bounds = array<i64: 1, 128>}, {pipeline_mode = #tpu.pipeline_mode<synchronous>, transform_indices = @transform_3, window_bounds = array<i64: 128, 128>}, {pipeline_mode = #tpu.pipeline_mode<synchronous>, transform_indices = @transform_4, window_bounds = array<i64: 1, 128>}, {transform_indices = @transform_5, window_bounds = array<i64: 64, 128>}]} {
    %c0 = arith.constant 0 : index
    %c0_0 = arith.constant 0 : index
    %0 = vector.load %arg1[%c0, %c0_0] : memref<64x128xf32, #tpu.memory_space<vmem>>, vector<64x128xf32>
    %c0_1 = arith.constant 0 : index
    %c0_2 = arith.constant 0 : index
    %1 = vector.load %arg2[%c0_1, %c0_2] : memref<128x128xbf16, #tpu.memory_space<vmem>>, vector<128x128xbf16>
    %c0_3 = arith.constant 0 : index
    %c0_4 = arith.constant 0 : index
    %2 = vector.load %arg3[%c0_3, %c0_4] : memref<1x128xf32, #tpu.memory_space<vmem>>, vector<1x128xf32>
    %3 = arith.truncf %0 : vector<64x128xf32> to vector<64x128xbf16>
    %cst = arith.constant dense<0.000000e+00> : vector<64x128xf32>
    %4 = tpu.matmul %3, %1, %cst {dimension_numbers = #tpu.dot_dimension_numbers<[1], [0], [0], [1], [0, 0, 1, 1], [], []>} : vector<64x128xbf16>, vector<128x128xbf16>, vector<64x128xf32> -> vector<64x128xf32>
    %5 = vector.broadcast %2 : vector<1x128xf32> to vector<64x128xf32>
    %6 = arith.addf %4, %5 : vector<64x128xf32>
    %cst_5 = arith.constant 0.000000e+00 : f32
    %7 = vector.broadcast %cst_5 : f32 to vector<64x128xf32>
    %8 = arith.maximumf %6, %7 : vector<64x128xf32>
    %c0_6 = arith.constant 0 : index
    %c0_7 = arith.constant 0 : index
    %9 = vector.load %arg4[%c0_6, %c0_7] : memref<128x128xbf16, #tpu.memory_space<vmem>>, vector<128x128xbf16>
    %c0_8 = arith.constant 0 : index
    %c0_9 = arith.constant 0 : index
    %10 = vector.load %arg5[%c0_8, %c0_9] : memref<1x128xf32, #tpu.memory_space<vmem>>, vector<1x128xf32>
    %11 = arith.truncf %8 : vector<64x128xf32> to vector<64x128xbf16>
    %cst_10 = arith.constant dense<0.000000e+00> : vector<64x128xf32>
    %12 = tpu.matmul %11, %9, %cst_10 {dimension_numbers = #tpu.dot_dimension_numbers<[1], [0], [0], [1], [0, 0, 1, 1], [], []>} : vector<64x128xbf16>, vector<128x128xbf16>, vector<64x128xf32> -> vector<64x128xf32>
    %13 = vector.broadcast %10 : vector<1x128xf32> to vector<64x128xf32>
    %14 = arith.addf %12, %13 : vector<64x128xf32>
    %cst_11 = arith.constant 0.000000e+00 : f32
    %15 = vector.broadcast %cst_11 : f32 to vector<64x128xf32>
    %16 = arith.maximumf %14, %15 : vector<64x128xf32>
    %c0_12 = arith.constant 0 : index
    %c0_13 = arith.constant 0 : index
    %17 = vector.load %arg6[%c0_12, %c0_13] : memref<64x128xf32, #tpu.memory_space<vmem>>, vector<64x128xf32>
    tpu.vector_store %arg6[%c0_12, %c0_13], %16 {strides = array<i32>} : memref<64x128xf32, #tpu.memory_space<vmem>>, vector<64x128xf32>,
    return
  }
  func.func @transform_0(%arg0: i32) -> (i32, i32) {
    %c0_i32 = arith.constant 0 : i32
    %c0_i32_0 = arith.constant 0 : i32
    return %arg0, %c0_i32 : i32, i32
  }
  func.func @transform_1(%arg0: i32) -> (i32, i32) {
    %c0_i32 = arith.constant 0 : i32
    %c0_i32_0 = arith.constant 0 : i32
    %c0_i32_1 = arith.constant 0 : i32
    return %c0_i32, %c0_i32_0 : i32, i32
  }
  func.func @transform_2(%arg0: i32) -> (i32, i32) {
    %c0_i32 = arith.constant 0 : i32
    %c0_i32_0 = arith.constant 0 : i32
    %c0_i32_1 = arith.constant 0 : i32
    return %c0_i32, %c0_i32_0 : i32, i32
  }
  func.func @transform_3(%arg0: i32) -> (i32, i32) {
    %c0_i32 = arith.constant 0 : i32
    %c0_i32_0 = arith.constant 0 : i32
    %c0_i32_1 = arith.constant 0 : i32
    return %c0_i32, %c0_i32_0 : i32, i32
  }
  func.func @transform_4(%arg0: i32) -> (i32, i32) {
    %c0_i32 = arith.constant 0 : i32
    %c0_i32_0 = arith.constant 0 : i32
    %c0_i32_1 = arith.constant 0 : i32
    return %c0_i32, %c0_i32_0 : i32, i32
  }
  func.func @transform_5(%arg0: i32) -> (i32, i32) {
    %c0_i32 = arith.constant 0 : i32
    %c0_i32_0 = arith.constant 0 : i32
    return %arg0, %c0_i32 : i32, i32
  }
}

</mosaic_0001>

<bundles_post_ra>
// kernel: tpu_custom_call.1
= control target key start
LH: loop header
LB: loop body
LE: loop exit
PB: predicated region body
PF: predicated region fallthrough
CT: control target
= control target key end

     0   :  { %10 = vsyncpa [#allocation3], 0  ;;  %s1290_s0 = inlined_call_operand.hbm [shape: f32[128,128], index: 0, kind: input, shape index: {}]   ;;  %s1291_s1 = inlined_call_operand.hbm [shape: bf16[128,128], index: 1, kind: input, shape index: {}]   ;;  %s1292_s2 = inlined_call_operand.vmem [shape: f32[1,128], index: 2, kind: input, shape index: {}]   ;;  %s1293_s3 = inlined_call_operand.hbm [shape: bf16[128,128], index: 3, kind: input, shape index: {}]   ;;  %s1294_s4 = inlined_call_operand.vmem [shape: f32[1,128], index: 4, kind: input, shape index: {}]   ;;  %s1295_s5 = inlined_call_operand.hbm [shape: f32[128,128], index: 5, kind: output, shape index: {}]  }
   0x1   :  { %12 = vsyncpa [#allocation3 + $0x1], 0 }
   0x2   :  { %13 = vsyncpa [#allocation6], 0 }
   0x3   :  { %14 = vsyncpa [#allocation4], 0 }
   0x4   :  { %16 = vsyncpa [#allocation4 + $0x1], 0  ;;  %s1082_s18 = smov 0   ;;  %s1084_s19 = smov 0  }
   0x5   :  { %s1086_s20 = smov 0   ;;  %s1088_s21 = smov 0  }
   0x6 LB: > { %s1103_s22 = sadd.s32 4294967295, %s1040_s21   ;;  %s693_s23 = sadd.s32 4294967294, %s1040_s21   ;;  %s1040_s21 = sphi %s1088_s21, %s1317_s21   ;;  %s1036_s20 = sphi %s1086_s20, %s1316_s20   ;;  %s1032_s19 = sphi %s1084_s19, %s1315_s19   ;;  %s1028_s18 = sphi %s1082_s18, %s1314_s18  }
   0x7   : > { %p42_p0 = scmp.ne.s32.totalorder %s1032_s19, %s1028_s18  ;;  %p1296_p1 = scmp.eq.s32.totalorder %s1103_s22, 0 }
   0x8   : > { %p156_p3 = scmp.eq.s32.totalorder %s693_s23, 1  ;;  %p694_p5 = scmp.ge.s32.totalorder %s1040_s21, 1 }
   0x9   : > { %p1112_p4 = por %p1296_p1, %p42_p0  ;;  %p163_p7 = scmp.lt.s32.totalorder %s1040_s21, 3 }
   0xa   : > { %p1117_p6 = por %p156_p3, %p42_p0  ;;  %s1042_s27 = smov [#allocation5]  }
   0xb   : > { %s1300_s24 = scalar_select %p1112_p4, 1, 0 }
   0xc   : > { %s1301_s25 = scalar_select %p1117_p6, 1, 0 }
   0xd   : > { %p1122_p8 = pnand %p694_p5, %p163_p7  ;;  %s175_s28 = sshll.u32 %s1042_s27, 4  ;;  %s176_s28 = int_to_ptr.vmem [resolvable:$true] %s175_s28 }
   0xe   : > { %s1043_s30 = smov [#allocation7]   ;;  %s903_s7 = scalar_lea.vmem %s176_s28, 1024 }
   0xf   : > { %s1302_s26 = scalar_select %p1122_p8, 1, 0 }
  0x10   : > { %p815_p9 = pneg %p1122_p8  ;;  %s191_s6 = sshll.u32 %s1043_s30, 4  ;;  %s192_s6 = int_to_ptr.vmem [resolvable:$true] %s191_s6 }
  0x11   : > { %p904_p13 = scmp.ne.s32.totalorder %s176_s28, %s903_s7  ;;  %p911_p5 = scmp.lt.s32.totalorder %s176_s28, %s176_s28 }
  0x12   : > { %p1131_p11 = pnand %p815_p9, %p1296_p1  ;;  %p912_p7 = scmp.lt.s32.totalorder %s903_s7, %s903_s7 }
  0x14   : > { %p894_p12 = pneg %p1131_p11  ;;  %p913_p10 = por %p912_p7, %p911_p5 }
  0x16   : > { %p906_p0 = pnand %p904_p13, %p894_p12 }
  0x18   : > { %p907_p3 = pneg %p906_p0 }
  0x1a   : > { %p914_p9 = pnand %p913_p10, %p907_p3 }
  0x1c   : > { %917 = shalt.err (!%p914_p9)
}
  0x1d   : > { %s1044_s8 = smov 64   ;;  %s1045_s9 = smov 4  }
  0x1e   : > { %818 = dma.hbm_to_vmem [thread:$0]  (!%p1131_p11), %s1291_s1, 1024, %s176_s28, [#allocation6], %s1044_s8, %s1044_s8, %s1045_s9  }
  0x1f   : > { %s929_s12 = scalar_lea.vmem %s192_s6, 1024  ;;  %p937_p2 = scmp.lt.s32.totalorder %s192_s6, %s192_s6 }
  0x20   : > { %p930_p1 = scmp.ne.s32.totalorder %s192_s6, %s929_s12  ;;  %p938_p6 = scmp.lt.s32.totalorder %s929_s12, %s929_s12 }
  0x22   : > { %p932_p13 = pnand %p930_p1, %p894_p12  ;;  %p939_p5 = por %p938_p6, %p937_p2 }
  0x24   : > { %p933_p0 = pneg %p932_p13 }
  0x26   : > { %p940_p10 = pnand %p939_p5, %p933_p0 }
  0x28   : > { %943 = shalt.err (!%p940_p10)
}
  0x29   : > { %821 = dma.hbm_to_vmem [thread:$0]  (!%p1131_p11), %s1293_s3, 1024, %s192_s6, [#allocation6], %s1044_s8, %s1044_s8, %s1045_s9  }
  0x2a   : > { %s1154_s15 = sadd.s32 1, %s1040_s21   ;;  %s29_s16 = sadd.s32 1, %s1036_s20 }
  0x2b   : > { %s26_s17 = ssub.s32 %s1040_s21, %s1154_s15  ;;  %p36_p1 = scmp.ne.s32.totalorder %s1036_s20, %s1032_s19 }
  0x2c   : > { %p27_p2 = scmp.eq.s32.totalorder %s26_s17, 0  ;;  %p37_p6 = scmp.eq.s32.totalorder %s1040_s21, 0 }
  0x2d   : > { %p1304_p12 = scmp.eq.s32.totalorder %s1103_s22, 1  ;;  %p832_p7 = scmp.lt.s32.totalorder %s1040_s21, 2 }
  0x2e   : > { %s1170_s27 = scalar_select %p27_p2, %s1036_s20, %s29_s16  }
  0x2f   : > { %p1164_p3 = por %p1304_p12, %p36_p1  ;;  %p38_p9 = por %p37_p6, %p36_p1 }
  0x30   : > { %s208_s28 = sand.u32 1, %s1036_s20   ;;  %s729_s30 = sshll.u32 %s1040_s21, 10 }
  0x31   : > { %s1305_s23 = scalar_select %p1164_p3, 1, 0 }
  0x32   : > { %s698_s29 = sshll.u32 %s208_s28, 6  ;;  %s1177_s8 = scalar_lea.hbm %s1290_s0, %s729_s30 }
  0x33   : > { %s212_s9 = scalar_lea.vmem [#allocation2], %s698_s29  ;;  %p1181_p11 = pnand %p832_p7, %p38_p9 }
  0x34   : > { %s219_s10 = sshll.u32 %s212_s9, 4  ;;  %s1185_s12 = scalar_lea.sflag [#allocation3], %s208_s28  ;;  %s1179_s10 = int_to_ptr.vmem [resolvable:$true] %s219_s10 }
  0x35   : > { %s944_s13 = scalar_lea.hbm %s1177_s8, 1024  ;;  %p946_p0 = pneg %p1181_p11 }
  0x36   : > { %p945_p13 = scmp.ne.s32.totalorder %s1177_s8, %s944_s13  ;;  %s949_s17 = scalar_lea.hbm %s1290_s0, 2048 }
  0x37   : > { %p950_p1 = scmp.lt.s32.totalorder %s1177_s8, %s1290_s0  ;;  %p951_p2 = scmp.lt.s32.totalorder %s949_s17, %s944_s13 }
  0x38   : > { %p947_p5 = pnand %p946_p0, %p945_p13 }
  0x39   : > { %p952_p6 = por %p951_p2, %p950_p1 }
  0x3a   : > { %p948_p10 = pneg %p947_p5 }
  0x3c   : > { %p953_p12 = pnand %p952_p6, %p948_p10 }
  0x3e   : > { %956 = shalt.err (!%p953_p12)
}
  0x3f   : > { %s957_s28 = scalar_lea.vmem %s1179_s10, 1024  ;;  %s1046_s6 = smov [#allocation2]  }
  0x40   : > { %p958_p7 = scmp.ne.s32.totalorder %s1179_s10, %s957_s28  ;;  %s962_s7 = sshll.u32 %s1046_s6, 4  ;;  %s963_s7 = int_to_ptr.vmem [resolvable:$false] %s962_s7 }
  0x41   : > { %s964_s9 = scalar_lea.vmem %s963_s7, 2048  ;;  %p965_p5 = scmp.lt.s32.totalorder %s1179_s10, %s963_s7 }
  0x42   : > { %p960_p9 = pnand %p958_p7, %p946_p0  ;;  %p966_p3 = scmp.lt.s32.totalorder %s964_s9, %s957_s28 }
  0x44   : > { %p961_p13 = pneg %p960_p9  ;;  %p967_p4 = por %p966_p3, %p965_p5 }
  0x46   : > { %p968_p8 = pnand %p967_p4, %p961_p13 }
  0x48   : > { %971 = shalt.err (!%p968_p8)
}
  0x49   : > { %s1047_s13 = smov 128   ;;  %s1048_s14 = smov 8  }
  0x4a   : > { %825 = dma.hbm_to_vmem [thread:$0]  (!%p1181_p11), %s1177_s8, 1024, %s1179_s10, %s1185_s12, %s1047_s13, %s1047_s13, %s1048_s14  }
  0x4b   : > { %p1307_p0 = scmp.ne.s32.totalorder %s1302_s26, 0 }
  0x4c   : > { %s1209_s16 = sand.u32 (!%p1307_p0), 1, %s1032_s19   ;;  %p1308_p4 = scmp.ne.s32.totalorder (!%p1307_p0), %s1300_s24, 0 }
  0x4d   : > { %231 = sbr.rel (%p1307_p0) target bundleno = 550 (0x226), region = 40  ;;  %s702_s17 = sshll.u32 (!%p1307_p0), %s1209_s16, 6 }
  0x4e   : > { %s234_s29 = scalar_lea.sflag (!%p1307_p0), [#allocation3], %s1209_s16  ;;  %s1215_s30 = scalar_lea.vmem (!%p1307_p0), [#allocation2], %s702_s17 }
  0x52   : > { %1015 = dma.done.wait (%p1308_p4), %s234_s29, 1024  }
  0x53   : > { %1017 = vsyncadd (%p1308_p4), %s234_s29, 4294966272  ;;  %p1309_p8 = scmp.eq.s32.totalorder %s1103_s22, 0 }
  0x55   : > { %1019 = dma.done.wait (%p1309_p8), [#allocation6], 2048   ;;  %p1310_p3 = pmov %p1309_p8 }
  0x56   : > { %v876_v0 = vld [vmem:[#allocation5 + $0x38] sm:$0xff]   ;;  %v877_v1 = vld [vmem:[#allocation5 + $0x30] sm:$0xff]   ;;  %v878_v2 = vld [vmem:[#allocation5 + $0x28] sm:$0xff]   ;;  %s271_s11 = scalar_lea.vmem [#allocation8], %s702_s17  ;;  %s730_s28 = sshll.u32 %s1103_s22, 10 }
  0x57   : > { %1021 = vsyncadd (%p1310_p3), [#allocation6], 4294965248  ;;  %755 = vmatprep.subr.bf16.mxu0 %v876_v0  ;;  %v879_v3 = vld [vmem:[#allocation5 + $0x20] sm:$0xff]   ;;  %v276_v5 = vld [vmem:[%s1215_s30 + $0x8] sm:$0xff]  ;;  %s601_s12 = sshll.u32 %s271_s11, 4  ;;  %s1247_s9 = scalar_lea.hbm %s1295_s5, %s730_s28  ;;  %s1242_s12 = int_to_ptr.vmem [resolvable:$true] %s601_s12 }
  0x58   : > { %756 = vmatpush3.bf16.msra.mxu0 %v876_v0  ;;  %v275_v4 = vld [vmem:[%s1215_s30] sm:$0xff]  ;;  %v880_v7 = vld [vmem:[#allocation5 + $0x18] sm:$0xff]   ;;  %v885_v9 = vld [vmem:[#allocation7 + $0x30] sm:$0xff]   ;;  %s588_s13 = scalar_lea.sflag [#allocation4], %s1209_s16  ;;  %s972_s14 = scalar_lea.vmem %s1242_s12, 1024 }
  0x59   : > { %757 = vmatprep.subr.bf16.mxu0 %v877_v1  ;;  %v300_v6 = vpack.c.bf16 %v276_v5, %v275_v4  ;;  %v884_v8 = vld [vmem:[#allocation7 + $0x38] sm:$0xff]   ;;  %v881_v10 = vld [vmem:[#allocation5 + $0x10] sm:$0xff]   ;;  %v886_v11 = vld [vmem:[#allocation7 + $0x28] sm:$0xff]   ;;  %p973_p11 = scmp.ne.s32.totalorder %s1242_s12, %s972_s14  ;;  %p1311_p10 = scmp.ne.s32.totalorder %s1305_s23, 0 }
  0x5a   : > { %779 = vmatprep.subr.bf16.mxu1 %v884_v8  ;;  %v887_v12 = vld [vmem:[#allocation7 + $0x20] sm:$0xff]   ;;  %v882_v13 = vld [vmem:[#allocation5 + $0x8] sm:$0xff]   ;;  %v888_v14 = vld [vmem:[#allocation7 + $0x18] sm:$0xff]   ;;  %s1049_s22 = smov [#allocation8]  }
  0x5b   : > { %771 = vmatprep.mubr.bf16.mxu0 %v300_v6  ;;  %780 = vmatpush3.bf16.msra.mxu1 %v884_v8  ;;  %v883_v15 = vld [vmem:[#allocation5] sm:$0xff]   ;;  %v277_v16 = vld [vmem:[%s1215_s30 + $0x10] sm:$0xff]  ;;  %v278_v17 = vld [vmem:[%s1215_s30 + $0x18] sm:$0xff]  ;;  %p974_p1 = pnand %p973_p11, %p1311_p10  ;;  %s976_s17 = sshll.u32 %s1049_s22, 4  ;;  %s977_s17 = int_to_ptr.vmem [resolvable:$false] %s976_s17 }
  0x5c   : > { %758 = vmatpush3.bf16.msra.mxu0 %v877_v1  ;;  %781 = vmatprep.subr.bf16.mxu1 %v885_v9  ;;  %v279_v18 = vld [vmem:[%s1215_s30 + $0x20] sm:$0xff]  ;;  %v280_v19 = vld [vmem:[%s1215_s30 + $0x28] sm:$0xff]  ;;  %v301_v20 = vpack.c.bf16 %v278_v17, %v277_v16  ;;  %v281_v22 = vld [vmem:[%s1215_s30 + $0x30] sm:$0xff]  ;;  %s978_s29 = scalar_lea.vmem %s977_s17, 2048  ;;  %p979_p6 = scmp.lt.s32.totalorder %s1242_s12, %s977_s17 }
  0x5d   : > { %759 = vmatprep.subr.bf16.mxu0 %v878_v2  ;;  %v302_v21 = vpack.c.bf16 %v280_v19, %v279_v18  ;;  %v282_v23 = vld [vmem:[%s1215_s30 + $0x38] sm:$0xff]  ;;  %v889_v25 = vld [vmem:[#allocation7 + $0x10] sm:$0xff]   ;;  %v890_v26 = vld [vmem:[#allocation7 + $0x8] sm:$0xff]   ;;  %p975_p2 = pneg %p974_p1  ;;  %p980_p12 = scmp.lt.s32.totalorder %s978_s29, %s972_s14 }
  0x5e   : > { %v303_v24 = vpack.c.bf16 %v282_v23, %v281_v22  ;;  %v891_v27 = vld [vmem:[#allocation7] sm:$0xff]  }
  0x5f   : > { %782 = vmatpush3.bf16.msra.mxu1 %v885_v9  ;;  %v706_v30 = vld [vmem:[%s1292_s2] ss:$0 sm:$0xff]  ;;  %p981_p7 = por %p980_p12, %p979_p6 }
  0x60   : > { %760 = vmatpush3.bf16.msra.mxu0 %v878_v2  ;;  %783 = vmatprep.subr.bf16.mxu1 %v886_v11  ;;  %v715_v57 = vld [vmem:[%s1294_s4] ss:$0 sm:$0xff] }
  0x61   : > { %761 = vmatprep.subr.bf16.mxu0 %v879_v3  ;;  %p982_p9 = pnand %p981_p7, %p975_p2 }
  0x63   : > { %784 = vmatpush3.bf16.msra.mxu1 %v886_v11 }
  0x64   : > { %762 = vmatpush3.bf16.msra.mxu0 %v879_v3  ;;  %785 = vmatprep.subr.bf16.mxu1 %v887_v12 }
  0x65   : > { %763 = vmatprep.subr.bf16.mxu0 %v880_v7 }
  0x67   : > { %786 = vmatpush3.bf16.msra.mxu1 %v887_v12 }
  0x68   : > { %764 = vmatpush3.bf16.msra.mxu0 %v880_v7  ;;  %787 = vmatprep.subr.bf16.mxu1 %v888_v14 }
  0x69   : > { %765 = vmatprep.subr.bf16.mxu0 %v881_v10 }
  0x6b   : > { %788 = vmatpush3.bf16.msra.mxu1 %v888_v14 }
  0x6c   : > { %766 = vmatpush3.bf16.msra.mxu0 %v881_v10  ;;  %789 = vmatprep.subr.bf16.mxu1 %v889_v25 }
  0x6d   : > { %767 = vmatprep.subr.bf16.mxu0 %v882_v13 }
  0x6f   : > { %790 = vmatpush3.bf16.msra.mxu1 %v889_v25 }
  0x70   : > { %768 = vmatpush3.bf16.msra.mxu0 %v882_v13  ;;  %791 = vmatprep.subr.bf16.mxu1 %v890_v26 }
  0x71   : > { %769 = vmatprep.subr.bf16.mxu0 %v883_v15 }
  0x73   : > { %792 = vmatpush3.bf16.msra.mxu1 %v890_v26 }
  0x74   : > { %770 = vmatpush3.bf16.msra.mxu0 %v883_v15  ;;  %793 = vmatprep.subr.bf16.mxu1 %v891_v27 }
  0x77   : > { %772 = vmatmul.mubr.bf16.vlgmr.msra.gmra.mxu0 %v301_v20  ;;  %794 = vmatpush3.bf16.msra.mxu1 %v891_v27 }
  0x78   : > { %775 = vmatprep.mubr.bf16.mxu0 %v302_v21 }
  0x7f   : > { %776 = vmatmul.mubr.bf16.gmra.mxu0 %v303_v24 }
 0x137   : > { %v773_v28 = vpop.f32.mrf.mxu0 }
 0x138   : > { %v401_v34 = vadd.f32 %v773_v28, %v706_v30 }
 0x139   : > { %v392_v29 = vpop.f32.mrf.mxu0 }
 0x13a   : > { %v393_v32 = vadd.f32 %v706_v30, %v392_v29  ;;  %v425_v41 = vmax.f32 %v401_v34, 0.0 }
 0x13b   : > { %v774_v31 = vpop.f32.mrf.mxu0 }
 0x13c   : > { %v404_v33 = vadd.f32 %v774_v31, %v706_v30  ;;  %v423_v39 = vmax.f32 %v393_v32, 0.0 }
 0x13d   : > { %v395_v35 = vpop.f32.mrf.mxu0 }
 0x13e   : > { %v396_v36 = vadd.f32 %v706_v30, %v395_v35  ;;  %v426_v37 = vmax.f32 %v404_v33, 0.0 }
 0x13f   : > { %v777_v38 = vpop.f32.mrf.mxu0 }
 0x140   : > { %v424_v40 = vmax.f32 %v396_v36, 0.0  ;;  %v449_v44 = vpack.c.bf16 %v426_v37, %v425_v41  ;;  %v417_v48 = vadd.f32 %v777_v38, %v706_v30 }
 0x141   : > { %v408_v42 = vpop.f32.mrf.mxu0 }
 0x142   : > { %v448_v43 = vpack.c.bf16 %v424_v40, %v423_v39  ;;  %v409_v46 = vadd.f32 %v706_v30, %v408_v42  ;;  %v429_v54 = vmax.f32 %v417_v48, 0.0 }
 0x143   : > { %v778_v45 = vpop.f32.mrf.mxu0 }
 0x144   : > { %v420_v47 = vadd.f32 %v778_v45, %v706_v30  ;;  %795 = vmatprep.mubr.bf16.mxu1 %v448_v43  ;;  %v427_v52 = vmax.f32 %v409_v46, 0.0 }
 0x145   : > { %v411_v49 = vpop.f32.mrf.mxu0  ;;  %796 = vmatmul.mubr.bf16.vlgmr.msra.gmra.mxu1 %v449_v44 }
 0x146   : > { %v412_v50 = vadd.f32 %v706_v30, %v411_v49  ;;  %v430_v51 = vmax.f32 %v420_v47, 0.0 }
 0x148   : > { %v428_v53 = vmax.f32 %v412_v50, 0.0  ;;  %v451_v56 = vpack.c.bf16 %v430_v51, %v429_v54 }
 0x14a   : > { %v450_v55 = vpack.c.bf16 %v428_v53, %v427_v52 }
 0x14c   : > { %799 = vmatprep.mubr.bf16.mxu1 %v450_v55 }
 0x14d   : > { %800 = vmatmul.mubr.bf16.gmra.mxu1 %v451_v56 }
 0x205   : > { %v797_v58 = vpop.f32.mrf.mxu1 }
 0x206   : > { %v549_v59 = vadd.f32 %v797_v58, %v715_v57 }
 0x207   : > { %v540_v60 = vpop.f32.mrf.mxu1 }
 0x208   : > { %v573_v61 = vmax.f32 %v549_v59, 0.0  ;;  %v541_v62 = vadd.f32 %v715_v57, %v540_v60 }
 0x209   : > { %v798_v63 = vpop.f32.mrf.mxu1 }
 0x20a   : > { %581 = vst [vmem:[%s271_s11 + $0x10] sm:$0xff] %v573_v61  ;;  %v571_v0 = vmax.f32 %v541_v62, 0.0  ;;  %v552_v1 = vadd.f32 %v798_v63, %v715_v57 }
 0x20b   : > { %v543_v2 = vpop.f32.mrf.mxu1 }
 0x20c   : > { %579 = vst [vmem:[%s271_s11] sm:$0xff] %v571_v0  ;;  %v574_v3 = vmax.f32 %v552_v1, 0.0  ;;  %v544_v4 = vadd.f32 %v715_v57, %v543_v2 }
 0x20d   : > { %v801_v5 = vpop.f32.mrf.mxu1 }
 0x20e   : > { %582 = vst [vmem:[%s271_s11 + $0x18] sm:$0xff] %v574_v3  ;;  %v572_v6 = vmax.f32 %v544_v4, 0.0  ;;  %v565_v7 = vadd.f32 %v801_v5, %v715_v57 }
 0x20f   : > { %v556_v8 = vpop.f32.mrf.mxu1 }
 0x210   : > { %580 = vst [vmem:[%s271_s11 + $0x8] sm:$0xff] %v572_v6  ;;  %v577_v9 = vmax.f32 %v565_v7, 0.0  ;;  %v557_v10 = vadd.f32 %v715_v57, %v556_v8 }
 0x211   : > { %v802_v11 = vpop.f32.mrf.mxu1 }
 0x212   : > { %585 = vst [vmem:[%s271_s11 + $0x30] sm:$0xff] %v577_v9  ;;  %v575_v12 = vmax.f32 %v557_v10, 0.0  ;;  %v568_v13 = vadd.f32 %v802_v11, %v715_v57 }
 0x213   : > { %v559_v14 = vpop.f32.mrf.mxu1 }
 0x214   : > { %583 = vst [vmem:[%s271_s11 + $0x20] sm:$0xff] %v575_v12  ;;  %v578_v15 = vmax.f32 %v568_v13, 0.0  ;;  %v560_v16 = vadd.f32 %v715_v57, %v559_v14 }
 0x216   : > { %586 = vst [vmem:[%s271_s11 + $0x38] sm:$0xff] %v578_v15  ;;  %v576_v17 = vmax.f32 %v560_v16, 0.0 }
 0x218   : > { %584 = vst [vmem:[%s271_s11 + $0x28] sm:$0xff] %v576_v17 }
 0x219   : > { %985 = shalt.err (!%p982_p9)
}
 0x21a   : > { %s986_s30 = scalar_lea.hbm %s1247_s9, 1024  ;;  %s990_s8 = scalar_lea.hbm %s1295_s5, 2048 }
 0x21b   : > { %p987_p13 = scmp.ne.s32.totalorder %s1247_s9, %s986_s30  ;;  %p991_p4 = scmp.lt.s32.totalorder %s1247_s9, %s1295_s5 }
 0x21c   : > { %p992_p8 = scmp.lt.s32.totalorder %s990_s8, %s986_s30 }
 0x21d   : > { %p988_p5 = pnand %p987_p13, %p1311_p10 }
 0x21e   : > { %p993_p3 = por %p992_p8, %p991_p4 }
 0x21f   : > { %p989_p0 = pneg %p988_p5 }
 0x221   : > { %p994_p11 = pnand %p993_p3, %p989_p0 }
 0x223   : > { %997 = shalt.err (!%p994_p11)
}
 0x224   : > { %s1050_s28 = smov 128   ;;  %s1051_s6 = smov 8  }
 0x225   : > { %813 = dma.vmem_to_hbm [thread:$0]  (%p1311_p10), %s1242_s12, 1024, %s1247_s9, %s588_s13, %s1050_s28, %s1050_s28, %s1051_s6  }
 0x226 PF: > { %s616_s7 = sand.u32 1, %s1028_s18   ;;  %p1312_p1 = scmp.ne.s32.totalorder %s1301_s25, 0 }
 0x227   : > { %p1313_p2 = scmp.ge.s32.totalorder %s1040_s21, 2  ;;  %s617_s14 = scalar_lea.sflag [#allocation4], %s616_s7 }
 0x229   : > { %p827_p6 = pnand %p1313_p2, %p1312_p1 }
 0x22b   : > { %p828_p12 = pneg %p827_p6 }
 0x22d   : > { %1023 = dma.done.wait (%p828_p12), %s617_s14, 1024  }
 0x22e   : > { %1025 = vsyncadd (%p828_p12), %s617_s14, 4294966272  ;;  %p19_p7 = scmp.ge.s32.totalorder %s1154_s15, 4   ;;  %s1314_s18 = smov %s1032_s19 }
 0x22f   : > { %s1315_s19 = smov %s1036_s20  ;;  %s1316_s20 = smov %s1170_s27 }
 0x230   : > { %s1317_s21 = smov %s1154_s15  ;;  %21 = sbr.rel (!%p19_p7) target bundleno = 6 (0x6), region = 93 }
 0x235   :  { %622 = vsyncpa [#allocation3], 1 }
 0x236   :  { %624 = vsyncpa [#allocation3 + $0x1], 1 }
 0x237   :  { %625 = vsyncpa [#allocation6], 1 }
 0x238   :  { %626 = vsyncpa [#allocation4], 1 }
 0x239   :  { %628 = vsyncpa [#allocation4 + $0x1], 1 }

</bundles_post_ra>
